<compile_context>
chip_gen: v5e
topology: v5e:2x2
jax: 0.10.0
libtpu: 0.0.40
codegen_flags: <defaults>
</compile_context>

<pallas_src>
import math
from functools import partial

import jax
import jax.numpy as jnp
from jax import lax
from jax.experimental import pallas as pl
from jax.experimental.pallas import tpu as pltpu

EPS = 1e-5
C_OUT = 32  # conv1 output channels


# ---------------- Pallas kernels ----------------

def _conv_relu_kernel(p_ref, w_ref, b_ref, out_ref):
    # (32, 9) @ (9, tr) -> (32, tr); bn0/bn1/conv-bias already folded into w/b.
    # Transposed output keeps the minor dim lane-dense (B*P), not 32.
    z = jnp.dot(w_ref[...], p_ref[...], preferred_element_type=jnp.float32)
    out_ref[...] = jnp.maximum(z + b_ref[...], 0.0).astype(out_ref.dtype)


def _fc_relu_kernel(x_ref, w_ref, b_ref, out_ref, acc_ref):
    # fc tiled (batch-parallel, hidden-reduction); bn2 folded into w/b.
    k = pl.program_id(1)

    @pl.when(k == 0)
    def _():
        acc_ref[...] = jnp.zeros_like(acc_ref)

    acc_ref[...] += jnp.dot(x_ref[...], w_ref[...],
                            preferred_element_type=jnp.float32)

    @pl.when(k == pl.num_programs(1) - 1)
    def _():
        h = jnp.maximum(acc_ref[...] + b_ref[...], 0.0)
        out_ref[...] = h.astype(out_ref.dtype)          # emit bf16 for the head


def _head_kernel(h_ref, embT_ref, b_ref, out_ref):
    # scores tile: (tb, D) bf16 @ (D, te) bf16 -> f32, plus entity bias.
    s = jnp.dot(h_ref[...], embT_ref[...], preferred_element_type=jnp.float32)
    out_ref[...] = s + b_ref[...]


# ---------------- helpers ----------------

def _round_up(n, m):
    return ((n + m - 1) // m) * m


def _pick_tile(n, align, cap):
    """Largest divisor of n <= cap that is a multiple of `align`; else n itself."""
    for t in range(min(n, cap), 0, -1):
        if n % t == 0 and (t % align == 0 or t == n):
            return t
    return n


def _bn_fold(gamma, beta, mean, var):
    scale = gamma / jnp.sqrt(var + EPS)
    shift = beta - mean * scale
    return scale, shift


def prepare_inference_params(params, emb_dim1, emb_dim2):
    """One-time folding / padding / transposition / casting (off the forward path)."""
    D = emb_dim1 * emb_dim2
    D_pad = _round_up(D, 128)     # lane-dense fc output / head contraction depth

    bn0_s, bn0_sh = _bn_fold(params["bn0_gamma"], params["bn0_beta"],
                             params["bn0_mean"], params["bn0_var"])
    bn1_s, bn1_sh = _bn_fold(params["bn1_gamma"], params["bn1_beta"],
                             params["bn1_mean"], params["bn1_var"])
    bn2_s, bn2_sh = _bn_fold(params["bn2_gamma"], params["bn2_beta"],
                             params["bn2_mean"], params["bn2_var"])

    # conv: fold bn0 (input affine) + bn1 (output affine) + conv bias; store
    # transposed (C, 9) so the kernel emits a lane-dense (C, B*P) activation.
    w9 = params["conv_w"].reshape(C_OUT, 9).T.astype(jnp.float32)        # (9, 32)
    conv_w_f = (w9 * (bn0_s[0] * bn1_s)[None, :]).T                      # (32, 9)
    conv_b_f = (bn0_sh[0] * w9.sum(axis=0) + params["conv_b"]) * bn1_s + bn1_sh

    # fc: torch Linear weight is (D, hidden) with hidden already in the
    # channel-major (c, oh, ow) order used by the kernels -> plain transpose,
    # fold bn2, pad D to D_pad, cast to bf16.
    fc_wT = params["fc_w"].T.astype(jnp.float32)                         # (hidden, D)
    fc_w_f = fc_wT * bn2_s[None, :]
    fc_b_f = params["fc_b"] * bn2_s + bn2_sh
    fc_w_pad = jnp.pad(fc_w_f, ((0, 0), (0, D_pad - D))).astype(jnp.bfloat16)
    fc_b_pad = jnp.pad(fc_b_f, (0, D_pad - D)).reshape(1, D_pad).astype(jnp.float32)

    # head: pre-transposed bf16 entity matrix; zero rows pad D to D_pad
    # (contribute nothing to the scores).
    embT = jnp.pad(params["emb_e"].T.astype(jnp.float32), ((0, D_pad - D), (0, 0)))
    embT_bf16 = embT.astype(jnp.bfloat16)                                # (D_pad, E)

    return {
        "emb_e": params["emb_e"].astype(jnp.float32),
        "emb_rel": params["emb_rel"].astype(jnp.float32),
        "conv_w": conv_w_f.astype(jnp.float32),                          # (32, 9)
        "conv_b": conv_b_f.reshape(C_OUT, 1).astype(jnp.float32),        # (32, 1)
        "fc_w": fc_w_pad,                                                # (hidden, D_pad) bf16
        "fc_b": fc_b_pad,                                                # (1, D_pad) f32
        "emb_e_T_bf16": embT_bf16,                                       # (D_pad, E) bf16
        "b": params["b"].reshape(1, -1).astype(jnp.float32),             # (1, E) f32
    }


# ---------------- forward ----------------

def conve_forward(prep, e1, rel, emb_dim1, emb_dim2):
    # glue: embedding lookup, stacking, im2col (cheap relative to fc / head).
    e1_img = jnp.take(prep["emb_e"], e1, axis=0).reshape(-1, emb_dim1, emb_dim2)
    rel_img = jnp.take(prep["emb_rel"], rel, axis=0).reshape(-1, emb_dim1, emb_dim2)
    stacked = jnp.concatenate([e1_img, rel_img], axis=1)                 # (B, 2*d1, d2)
    B, H, W = stacked.shape
    OH, OW = H - 2, W - 2
    P = OH * OW

    # tap-major im2col (9, B*P): lets the conv kernel write a lane-dense
    # transposed activation (32, B*P) instead of a masked-store (B*P, 32).
    taps = [stacked[:, di:di + OH, dj:dj + OW] for di in range(3) for dj in range(3)]
    patches = jnp.stack(taps, axis=0).reshape(9, B * P).astype(jnp.float32)

    # ---- conv (+folded bn0/bn1) + relu ----
    n_cols = B * P
    tr = _pick_tile(n_cols, 128, 4096)
    conv_out = pl.pallas_call(
        _conv_relu_kernel,
        out_shape=jax.ShapeDtypeStruct((C_OUT, n_cols), jnp.bfloat16),
        grid=(n_cols // tr,),
        in_specs=[
            pl.BlockSpec((9, tr), lambda i: (0, i)),
            pl.BlockSpec((C_OUT, 9), lambda i: (0, 0)),
            pl.BlockSpec((C_OUT, 1), lambda i: (0, 0)),
        ],
        out_specs=pl.BlockSpec((C_OUT, tr), lambda i: (0, i)),
        compiler_params=pltpu.CompilerParams(dimension_semantics=("parallel",)),
    )(patches, prep["conv_w"], prep["conv_b"])

    # Channel-major flatten == PyTorch's native (c, oh, ow) hidden order, so
    # fc_w needs no row permutation.  One small bf16 relayout copy remains.
    # TODO(synk): fuse conv+fc into a single kernel to eliminate this relayout.
    flat = conv_out.reshape(C_OUT, B, P).transpose(1, 0, 2).reshape(B, C_OUT * P)

    # ---- fc (+folded bn2) + relu: batch-parallel x hidden-reduction grid ----
    hidden = C_OUT * P
    D_pad = prep["fc_w"].shape[1]
    tbf = min(256, B)
    tk = _pick_tile(hidden, 128, 2048)
    h_bf16 = pl.pallas_call(
        _fc_relu_kernel,
        out_shape=jax.ShapeDtypeStruct((B, D_pad), jnp.bfloat16),
        grid=(pl.cdiv(B, tbf), hidden // tk),
        in_specs=[
            pl.BlockSpec((tbf, tk), lambda i, k: (i, k)),
            pl.BlockSpec((tk, D_pad), lambda i, k: (k, 0)),
            pl.BlockSpec((1, D_pad), lambda i, k: (0, 0)),
        ],
        out_specs=pl.BlockSpec((tbf, D_pad), lambda i, k: (i, 0)),
        scratch_shapes=[pltpu.VMEM((tbf, D_pad), jnp.float32)],
        compiler_params=pltpu.CompilerParams(
            dimension_semantics=("parallel", "arbitrary")),
    )(flat, prep["fc_w"], prep["fc_b"])

    # ---- head: scores = h @ emb_e.T + b ----
    # Entity-outer / batch-inner grid: the (D_pad, te) embT tile and the bias
    # tile have constant block indices across the inner batch loop, so they stay
    # resident in VMEM and emb_e.T streams from HBM exactly once per forward.
    # pl.cdiv grids handle any E / B (masked tail) without tile-size blow-ups.
    E = prep["emb_e_T_bf16"].shape[1]
    tb = min(256, B)
    te = min(4096, _round_up(E, 128))
    flops = 2 * B * D_pad * E
    bytes_accessed = 2 * B * D_pad + 2 * D_pad * E + 4 * E + 4 * B * E
    scores = pl.pallas_call(
        _head_kernel,
        out_shape=jax.ShapeDtypeStruct((B, E), jnp.float32),
        grid=(pl.cdiv(E, te), pl.cdiv(B, tb)),
        in_specs=[
            pl.BlockSpec((tb, D_pad), lambda j, i: (i, 0)),
            pl.BlockSpec((D_pad, te), lambda j, i: (0, j)),
            pl.BlockSpec((1, te), lambda j, i: (0, j)),
        ],
        out_specs=pl.BlockSpec((tb, te), lambda j, i: (i, j)),
        compiler_params=pltpu.CompilerParams(
            dimension_semantics=("parallel", "parallel"),
            vmem_limit_bytes=32 * 1024 * 1024,
        ),
        cost_estimate=pl.CostEstimate(
            flops=int(flops), transcendentals=0, bytes_accessed=int(bytes_accessed)),
    )(h_bf16, prep["emb_e_T_bf16"], prep["b"])
    return scores


# ---------------- pure-JAX reference (eval-mode ConvE) ----------------

def _conve_reference(params, e1, rel, d1, d2):
    def bn(x, g, b, m, v, axis):
        shp = [1] * x.ndim
        shp[axis] = -1
        s = g.reshape(shp) / jnp.sqrt(v.reshape(shp) + EPS)
        return (x - m.reshape(shp)) * s + b.reshape(shp)

    e1_img = jnp.take(params["emb_e"], e1, axis=0).reshape(-1, 1, d1, d2)
    rel_img = jnp.take(params["emb_rel"], rel, axis=0).reshape(-1, 1, d1, d2)
    x = jnp.concatenate([e1_img, rel_img], axis=2)
    x = bn(x, params["bn0_gamma"], params["bn0_beta"], params["bn0_mean"], params["bn0_var"], 1)
    x = lax.conv_general_dilated(x, params["conv_w"], (1, 1), "VALID",
                                 dimension_numbers=("NCHW", "OIHW", "NCHW"))
    x = x + params["conv_b"].reshape(1, -1, 1, 1)
    x = bn(x, params["bn1_gamma"], params["bn1_beta"], params["bn1_mean"], params["bn1_var"], 1)
    x = jnp.maximum(x, 0.0)
    x = x.reshape(x.shape[0], -1)
    x = x @ params["fc_w"].T + params["fc_b"]
    x = bn(x, params["bn2_gamma"], params["bn2_beta"], params["bn2_mean"], params["bn2_var"], 1)
    x = jnp.maximum(x, 0.0)
    x = x @ params["emb_e"].T + params["b"]
    return x


# ---------------- deterministic parameter init (synthetic) ----------------

def init_params(key, embedding_dim, num_entities, num_relations):
    d1 = int(math.isqrt(embedding_dim))
    assert d1 * d1 == embedding_dim, "embedding_dim must be a perfect square"
    hidden = C_OUT * (2 * d1 - 2) * (d1 - 2)
    ks = jax.random.split(key, 12)

    def nrm(k, shape, s=0.1):
        return (jax.random.normal(k, shape) * s).astype(jnp.float32)

    p = {}
    p["emb_e"] = nrm(ks[0], (num_entities, embedding_dim)).at[0].set(0.0)     # padding_idx=0
    p["emb_rel"] = nrm(ks[1], (num_relations, embedding_dim)).at[0].set(0.0)  # padding_idx=0
    p["conv_w"] = nrm(ks[2], (C_OUT, 1, 3, 3), 0.2)
    p["conv_b"] = nrm(ks[3], (C_OUT,), 0.01)
    p["bn0_gamma"] = 1.0 + nrm(ks[4], (1,), 0.05)
    p["bn0_beta"] = nrm(ks[5], (1,), 0.05)
    p["bn0_mean"] = jnp.zeros((1,), jnp.float32)
    p["bn0_var"] = jnp.ones((1,), jnp.float32)
    p["bn1_gamma"] = 1.0 + nrm(ks[6], (C_OUT,), 0.05)
    p["bn1_beta"] = nrm(ks[7], (C_OUT,), 0.05)
    p["bn1_mean"] = jnp.zeros((C_OUT,), jnp.float32)
    p["bn1_var"] = jnp.ones((C_OUT,), jnp.float32)
    p["bn2_gamma"] = 1.0 + nrm(ks[8], (embedding_dim,), 0.05)
    p["bn2_beta"] = nrm(ks[9], (embedding_dim,), 0.05)
    p["bn2_mean"] = jnp.zeros((embedding_dim,), jnp.float32)
    p["bn2_var"] = jnp.ones((embedding_dim,), jnp.float32)
    p["fc_w"] = nrm(ks[10], (embedding_dim, hidden), 1.0 / math.sqrt(hidden))  # Linear(hidden, D)
    p["fc_b"] = nrm(ks[11], (embedding_dim,), 0.01)
    p["b"] = jnp.zeros((num_entities,), jnp.float32)   # register_parameter('b', zeros(num_entities))
    return p


if __name__ == "__main__":
    embedding_dim = 64          # emb_dim1 = emb_dim2 = 8 -> conv input (B, 1, 16, 8)
    num_entities = 128
    num_relations = 32
    batch = 8

    key = jax.random.PRNGKey(0)
    pkey, ekey, rkey = jax.random.split(key, 3)
    params = init_params(pkey, embedding_dim, num_entities, num_relations)
    e1 = jax.random.randint(ekey, (batch,), 0, num_entities, dtype=jnp.int32)
    rel = jax.random.randint(rkey, (batch,), 0, num_relations, dtype=jnp.int32)

    d1 = int(math.isqrt(embedding_dim))

    # one-time init-side folding / transposes / padding / casts
    prep = prepare_inference_params(params, d1, d1)

    fwd = jax.jit(partial(conve_forward, emb_dim1=d1, emb_dim2=d1))
    pred = fwd(prep, e1, rel)
    pred = jax.block_until_ready(pred)

    assert pred.shape == (batch, num_entities), pred.shape
    assert bool(jnp.all(jnp.isfinite(pred)))

    # correctness vs pure-JAX eval-mode reference (bf16 fc/head matmuls -> small drift)
    ref = _conve_reference(params, e1, rel, d1, d1)
    rel_err = float(jnp.max(jnp.abs(pred - ref)) / (jnp.max(jnp.abs(ref)) + 1e-6))
    assert rel_err < 5e-2, f"relative error too large: {rel_err}"

    print("KERNEL_OK")
</pallas_src>

<mosaic_0001>
module attributes {stable_mosaic.version = 11 : i64} {
  func.func @_conv_relu_kernel(%arg0: i32, %arg1: memref<9x672xf32, #tpu.memory_space<vmem>>, %arg2: memref<32x9xf32, #tpu.memory_space<vmem>>, %arg3: memref<32x1xf32, #tpu.memory_space<vmem>>, %arg4: memref<32x672xbf16, #tpu.memory_space<vmem>>) attributes {dimension_semantics = [#tpu.dimension_semantics<parallel>], iteration_bounds = array<i64: 1>, scalar_prefetch = 0 : i64, scratch_operands = 0 : i64, tpu.core_type = #tpu.core_type<tc>, window_params = [{transform_indices = @transform_0, window_bounds = array<i64: 9, 672>}, {pipeline_mode = #tpu.pipeline_mode<synchronous>, transform_indices = @transform_1, window_bounds = array<i64: 32, 9>}, {pipeline_mode = #tpu.pipeline_mode<synchronous>, transform_indices = @transform_2, window_bounds = array<i64: 32, 1>}, {transform_indices = @transform_3, window_bounds = array<i64: 32, 672>}]} {
    %c0 = arith.constant 0 : index
    %c0_0 = arith.constant 0 : index
    %0 = vector.load %arg2[%c0, %c0_0] : memref<32x9xf32, #tpu.memory_space<vmem>>, vector<32x9xf32>
    %c0_1 = arith.constant 0 : index
    %c0_2 = arith.constant 0 : index
    %1 = vector.load %arg1[%c0_1, %c0_2] : memref<9x672xf32, #tpu.memory_space<vmem>>, vector<9x672xf32>
    %cst = arith.constant dense<0.000000e+00> : vector<32x672xf32>
    %2 = tpu.matmul %0, %1, %cst {dimension_numbers = #tpu.dot_dimension_numbers<[1], [0], [0], [1], [0, 0, 1, 1], [], []>} : vector<32x9xf32>, vector<9x672xf32>, vector<32x672xf32> -> vector<32x672xf32>
    %c0_3 = arith.constant 0 : index
    %c0_4 = arith.constant 0 : index
    %3 = vector.load %arg3[%c0_3, %c0_4] : memref<32x1xf32, #tpu.memory_space<vmem>>, vector<32x1xf32>
    %4 = vector.broadcast %3 : vector<32x1xf32> to vector<32x672xf32>
    %5 = arith.addf %2, %4 : vector<32x672xf32>
    %cst_5 = arith.constant 0.000000e+00 : f32
    %6 = vector.broadcast %cst_5 : f32 to vector<32x672xf32>
    %7 = arith.maximumf %5, %6 : vector<32x672xf32>
    %8 = arith.truncf %7 : vector<32x672xf32> to vector<32x672xbf16>
    %c0_6 = arith.constant 0 : index
    %c0_7 = arith.constant 0 : index
    %9 = vector.load %arg4[%c0_6, %c0_7] : memref<32x672xbf16, #tpu.memory_space<vmem>>, vector<32x672xbf16>
    tpu.vector_store %arg4[%c0_6, %c0_7], %8 {strides = array<i32>} : memref<32x672xbf16, #tpu.memory_space<vmem>>, vector<32x672xbf16>,
    return
  }
  func.func @transform_0(%arg0: i32) -> (i32, i32) {
    %c0_i32 = arith.constant 0 : i32
    %c0_i32_0 = arith.constant 0 : i32
    return %c0_i32, %arg0 : i32, i32
  }
  func.func @transform_1(%arg0: i32) -> (i32, i32) {
    %c0_i32 = arith.constant 0 : i32
    %c0_i32_0 = arith.constant 0 : i32
    %c0_i32_1 = arith.constant 0 : i32
    return %c0_i32, %c0_i32_0 : i32, i32
  }
  func.func @transform_2(%arg0: i32) -> (i32, i32) {
    %c0_i32 = arith.constant 0 : i32
    %c0_i32_0 = arith.constant 0 : i32
    %c0_i32_1 = arith.constant 0 : i32
    return %c0_i32, %c0_i32_0 : i32, i32
  }
  func.func @transform_3(%arg0: i32) -> (i32, i32) {
    %c0_i32 = arith.constant 0 : i32
    %c0_i32_0 = arith.constant 0 : i32
    return %c0_i32, %arg0 : i32, i32
  }
}

module attributes {stable_mosaic.version = 11 : i64} {
  func.func @_fc_relu_kernel(%arg0: i32, %arg1: i32, %arg2: memref<8x896xbf16, #tpu.memory_space<vmem>>, %arg3: memref<896x128xbf16, #tpu.memory_space<vmem>>, %arg4: memref<1x128xf32, #tpu.memory_space<vmem>>, %arg5: memref<8x128xbf16, #tpu.memory_space<vmem>>, %arg6: memref<8x128xf32, #tpu.memory_space<vmem>>) attributes {dimension_semantics = [#tpu.dimension_semantics<parallel>, #tpu.dimension_semantics<arbitrary>], iteration_bounds = array<i64: 1, 3>, scalar_prefetch = 0 : i64, scratch_operands = 1 : i64, tpu.core_type = #tpu.core_type<tc>, window_params = [{transform_indices = @transform_0, window_bounds = array<i64: 8, 896>}, {transform_indices = @transform_1, window_bounds = array<i64: 896, 128>}, {pipeline_mode = #tpu.pipeline_mode<synchronous>, transform_indices = @transform_2, window_bounds = array<i64: 1, 128>}, {transform_indices = @transform_3, window_bounds = array<i64: 8, 128>}]} {
    %c0_i32 = arith.constant 0 : i32
    %0 = arith.cmpi eq, %arg1, %c0_i32 : i32
    %1 = arith.extui %0 : i1 to i32
    %c0_i32_0 = arith.constant 0 : i32
    %2 = arith.cmpi ne, %1, %c0_i32_0 : i32
    scf.if %2 {
      %cst_9 = arith.constant 0.000000e+00 : f32
      %12 = vector.broadcast %cst_9 : f32 to vector<8x128xf32>
      %c0_10 = arith.constant 0 : index
      %c0_11 = arith.constant 0 : index
      %13 = vector.load %arg6[%c0_10, %c0_11] : memref<8x128xf32, #tpu.memory_space<vmem>>, vector<8x128xf32>
      tpu.vector_store %arg6[%c0_10, %c0_11], %12 {strides = array<i32>} : memref<8x128xf32, #tpu.memory_space<vmem>>, vector<8x128xf32>,
    } else {
    }
    %c0 = arith.constant 0 : index
    %c0_1 = arith.constant 0 : index
    %3 = vector.load %arg6[%c0, %c0_1] : memref<8x128xf32, #tpu.memory_space<vmem>>, vector<8x128xf32>
    %c0_2 = arith.constant 0 : index
    %c0_3 = arith.constant 0 : index
    %4 = vector.load %arg2[%c0_2, %c0_3] : memref<8x896xbf16, #tpu.memory_space<vmem>>, vector<8x896xbf16>
    %c0_4 = arith.constant 0 : index
    %c0_5 = arith.constant 0 : index
    %5 = vector.load %arg3[%c0_4, %c0_5] : memref<896x128xbf16, #tpu.memory_space<vmem>>, vector<896x128xbf16>
    %cst = arith.constant dense<0.000000e+00> : vector<8x128xf32>
    %6 = tpu.matmul %4, %5, %cst {dimension_numbers = #tpu.dot_dimension_numbers<[1], [0], [0], [1], [0, 0, 1, 1], [], []>} : vector<8x896xbf16>, vector<896x128xbf16>, vector<8x128xf32> -> vector<8x128xf32>
    %7 = arith.addf %3, %6 : vector<8x128xf32>
    %c0_6 = arith.constant 0 : index
    %c0_7 = arith.constant 0 : index
    %8 = vector.load %arg6[%c0_6, %c0_7] : memref<8x128xf32, #tpu.memory_space<vmem>>, vector<8x128xf32>
    tpu.vector_store %arg6[%c0_6, %c0_7], %7 {strides = array<i32>} : memref<8x128xf32, #tpu.memory_space<vmem>>, vector<8x128xf32>,
    %c2_i32 = arith.constant 2 : i32
    %9 = arith.cmpi eq, %arg1, %c2_i32 : i32
    %10 = arith.extui %9 : i1 to i32
    %c0_i32_8 = arith.constant 0 : i32
    %11 = arith.cmpi ne, %10, %c0_i32_8 : i32
    scf.if %11 {
      %c0_9 = arith.constant 0 : index
      %c0_10 = arith.constant 0 : index
      %12 = vector.load %arg6[%c0_9, %c0_10] : memref<8x128xf32, #tpu.memory_space<vmem>>, vector<8x128xf32>
      %c0_11 = arith.constant 0 : index
      %c0_12 = arith.constant 0 : index
      %13 = vector.load %arg4[%c0_11, %c0_12] : memref<1x128xf32, #tpu.memory_space<vmem>>, vector<1x128xf32>
      %14 = vector.broadcast %13 : vector<1x128xf32> to vector<8x128xf32>
      %15 = arith.addf %12, %14 : vector<8x128xf32>
      %cst_13 = arith.constant 0.000000e+00 : f32
      %16 = vector.broadcast %cst_13 : f32 to vector<8x128xf32>
      %17 = arith.maximumf %15, %16 : vector<8x128xf32>
      %18 = arith.truncf %17 : vector<8x128xf32> to vector<8x128xbf16>
      %c0_14 = arith.constant 0 : index
      %c0_15 = arith.constant 0 : index
      %19 = vector.load %arg5[%c0_14, %c0_15] : memref<8x128xbf16, #tpu.memory_space<vmem>>, vector<8x128xbf16>
      tpu.vector_store %arg5[%c0_14, %c0_15], %18 {strides = array<i32>} : memref<8x128xbf16, #tpu.memory_space<vmem>>, vector<8x128xbf16>,
    } else {
    }
    return
  }
  func.func @transform_0(%arg0: i32, %arg1: i32) -> (i32, i32) {
    %c0_i32 = arith.constant 0 : i32
    return %arg0, %arg1 : i32, i32
  }
  func.func @transform_1(%arg0: i32, %arg1: i32) -> (i32, i32) {
    %c0_i32 = arith.constant 0 : i32
    %c0_i32_0 = arith.constant 0 : i32
    return %arg1, %c0_i32 : i32, i32
  }
  func.func @transform_2(%arg0: i32, %arg1: i32) -> (i32, i32) {
    %c0_i32 = arith.constant 0 : i32
    %c0_i32_0 = arith.constant 0 : i32
    %c0_i32_1 = arith.constant 0 : i32
    return %c0_i32, %c0_i32_0 : i32, i32
  }
  func.func @transform_3(%arg0: i32, %arg1: i32) -> (i32, i32) {
    %c0_i32 = arith.constant 0 : i32
    %c0_i32_0 = arith.constant 0 : i32
    return %arg0, %c0_i32 : i32, i32
  }
}

module attributes {stable_mosaic.version = 11 : i64} {
  func.func @_head_kernel(%arg0: i32, %arg1: i32, %arg2: memref<8x128xbf16, #tpu.memory_space<vmem>>, %arg3: memref<128x128xbf16, #tpu.memory_space<vmem>>, %arg4: memref<1x128xf32, #tpu.memory_space<vmem>>, %arg5: memref<8x128xf32, #tpu.memory_space<vmem>>) attributes {dimension_semantics = [#tpu.dimension_semantics<parallel>, #tpu.dimension_semantics<parallel>], iteration_bounds = array<i64: 1, 1>, scalar_prefetch = 0 : i64, scratch_operands = 0 : i64, tpu.core_type = #tpu.core_type<tc>, window_params = [{transform_indices = @transform_0, window_bounds = array<i64: 8, 128>}, {transform_indices = @transform_1, window_bounds = array<i64: 128, 128>}, {transform_indices = @transform_2, window_bounds = array<i64: 1, 128>}, {transform_indices = @transform_3, window_bounds = array<i64: 8, 128>}]} {
    %c0 = arith.constant 0 : index
    %c0_0 = arith.constant 0 : index
    %0 = vector.load %arg2[%c0, %c0_0] : memref<8x128xbf16, #tpu.memory_space<vmem>>, vector<8x128xbf16>
    %c0_1 = arith.constant 0 : index
    %c0_2 = arith.constant 0 : index
    %1 = vector.load %arg3[%c0_1, %c0_2] : memref<128x128xbf16, #tpu.memory_space<vmem>>, vector<128x128xbf16>
    %cst = arith.constant dense<0.000000e+00> : vector<8x128xf32>
    %2 = tpu.matmul %0, %1, %cst {dimension_numbers = #tpu.dot_dimension_numbers<[1], [0], [0], [1], [0, 0, 1, 1], [], []>} : vector<8x128xbf16>, vector<128x128xbf16>, vector<8x128xf32> -> vector<8x128xf32>
    %c0_3 = arith.constant 0 : index
    %c0_4 = arith.constant 0 : index
    %3 = vector.load %arg4[%c0_3, %c0_4] : memref<1x128xf32, #tpu.memory_space<vmem>>, vector<1x128xf32>
    %4 = vector.broadcast %3 : vector<1x128xf32> to vector<8x128xf32>
    %5 = arith.addf %2, %4 : vector<8x128xf32>
    %c0_5 = arith.constant 0 : index
    %c0_6 = arith.constant 0 : index
    %6 = vector.load %arg5[%c0_5, %c0_6] : memref<8x128xf32, #tpu.memory_space<vmem>>, vector<8x128xf32>
    tpu.vector_store %arg5[%c0_5, %c0_6], %5 {strides = array<i32>} : memref<8x128xf32, #tpu.memory_space<vmem>>, vector<8x128xf32>,
    return
  }
  func.func @transform_0(%arg0: i32, %arg1: i32) -> (i32, i32) {
    %c0_i32 = arith.constant 0 : i32
    %c0_i32_0 = arith.constant 0 : i32
    return %arg1, %c0_i32 : i32, i32
  }
  func.func @transform_1(%arg0: i32, %arg1: i32) -> (i32, i32) {
    %c0_i32 = arith.constant 0 : i32
    %c0_i32_0 = arith.constant 0 : i32
    return %c0_i32, %arg0 : i32, i32
  }
  func.func @transform_2(%arg0: i32, %arg1: i32) -> (i32, i32) {
    %c0_i32 = arith.constant 0 : i32
    %c0_i32_0 = arith.constant 0 : i32
    return %c0_i32, %arg0 : i32, i32
  }
  func.func @transform_3(%arg0: i32, %arg1: i32) -> (i32, i32) {
    %c0_i32 = arith.constant 0 : i32
    return %arg1, %arg0 : i32, i32
  }
}

</mosaic_0001>

<bundles_post_ra>
// kernel: conve_forward.3
= control target key start
LH: loop header
LB: loop body
LE: loop exit
PB: predicated region body
PF: predicated region fallthrough
CT: control target
= control target key end

     0   :  { %vm67_vm0 = vcmask 1040384   ;;  %v352_v3 = vmov 0   ;;  %vm54_vm1 = vcmask 72704   ;;  %vm298_vm2 = vcmask 1043456   ;;  %s529_s0 = inlined_call_operand.vmem [shape: f32[9,672], index: 0, kind: input, shape index: {}]   ;;  %s530_s1 = inlined_call_operand.vmem [shape: f32[32,9], index: 1, kind: input, shape index: {}]   ;;  %s531_s2 = inlined_call_operand.vmem [shape: f32[32,1], index: 2, kind: input, shape index: {}]   ;;  %s532_s3 = inlined_call_operand.vmem [shape: bf16[32,672], index: 3, kind: output, shape index: {}]  }
   0x1   :  { %v24_v0 = vld [vmem:[%s529_s0 + $0x30] sm:$0x1]  ;;  %v25_v1 = vld [vmem:[%s529_s0 + $0x38] sm:$0x1]  ;;  %v18_v2 = vld [vmem:[%s529_s0] sm:$0xff]  ;;  %351 = vset.pattern.permute.xlu1 %v352_v3  ;;  %350 = vset.pattern.permute.xlu0 %v352_v3  ;;  %vm299_vm3 = vcmask 261124  }
   0x2   :  { %315 = vmatpush.msk.msra.mxu0 %vm67_vm0, %v24_v0  ;;  %345 = vmatpush.msk.msra.mxu2 %vm67_vm0, %v24_v0  ;;  %v19_v4 = vld [vmem:[%s529_s0 + $0x8] sm:$0xff]  ;;  %v14_v5 = vld [vmem:[%s530_s1] sm:$0xff]  ;;  %v16_v6 = vld [vmem:[%s530_s1 + $0x10] sm:$0xff] }
   0x3   :  { %320 = vmatpush.msk.msra.mxu1 %vm67_vm0, %v25_v1  ;;  %347 = vmatpush.msk.msra.mxu3 %vm67_vm0, %v25_v1  ;;  %v26_v7 = vld [vmem:[%s529_s0 + $0x40] sm:$0x1]  ;;  %v27_v8 = vld [vmem:[%s529_s0 + $0x48] sm:$0x1]  ;;  %v28_v9 = vld [vmem:[%s529_s0 + $0x50] sm:$0x1] }
   0x4   :  { %101 = vmatpush.msra.mxu0 %v18_v2  ;;  %346 = vmatpush.msra.mxu2 %v18_v2  ;;  %v29_v10 = vld [vmem:[%s529_s0 + $0x58] sm:$0x1]  ;;  %v20_v11 = vld [vmem:[%s529_s0 + $0x10] sm:$0xff]  ;;  %v22_v13 = vld [vmem:[%s529_s0 + $0x20] sm:$0xff] }
   0x5   :  { %130 = vmatpush.msra.mxu1 %v19_v4  ;;  %348 = vmatpush.msra.mxu3 %v19_v4  ;;  %v21_v12 = vld [vmem:[%s529_s0 + $0x18] sm:$0xff]  ;;  %v23_v14 = vld [vmem:[%s529_s0 + $0x28] sm:$0xff]  ;;  %v32_v15 = vld [vmem:[%s531_s2 + $0x10] sm:$0xff] }
   0x6   :  { %316 = vmatmul.msk.f32.vlgmr.msra.gmra.mxu0 %vm54_vm1, %v14_v5  ;;  %318 = vmatmul.msk.f32.vlgmr.msra.gmra.mxu2 %vm54_vm1, %v16_v6  ;;  %v30_v16 = vld [vmem:[%s531_s2] sm:$0xff]  ;;  %v15_v17 = vld [vmem:[%s530_s1 + $0x8] sm:$0xff]  ;;  %v17_v18 = vld [vmem:[%s530_s1 + $0x18] sm:$0xff] }
   0x7   :  { %321 = vmatmul.msk.f32.vlgmr.msra.gmra.mxu1 %vm54_vm1, %v14_v5  ;;  %323 = vmatmul.msk.f32.vlgmr.msra.gmra.mxu3 %vm54_vm1, %v16_v6  ;;  %v33_v19 = vld [vmem:[%s531_s2 + $0x18] sm:$0xff]  ;;  %v31_v20 = vld [vmem:[%s531_s2 + $0x8] sm:$0xff]  ;;  %vm482_vm4 = vmor %vm299_vm3, %vm298_vm2 }
   0x8   :  { %325 = vmatpush.msk.msrb.mxu2 %vm67_vm0, %v26_v7  ;;  %330 = vmatpush.msk.msrb.mxu3 %vm67_vm0, %v27_v8 }
   0x9   :  { %335 = vmatpush.msk.msrb.mxu0 %vm67_vm0, %v28_v9  ;;  %340 = vmatpush.msk.msrb.mxu1 %vm67_vm0, %v29_v10 }
   0xa   :  { %159 = vmatpush.msrb.mxu2 %v20_v11  ;;  %188 = vmatpush.msrb.mxu3 %v21_v12 }
   0xb   :  { %217 = vmatpush.msrb.mxu0 %v22_v13  ;;  %246 = vmatpush.msrb.mxu1 %v23_v14 }
   0xc   :  { %46 = vperm.xlu1 %351, %v32_v15   ;;  %36 = vperm.xlu0 %350, %v30_v16  }
   0xe   :  { %317 = vmatmul.msk.f32.gmra.mxu0 %vm54_vm1, %v15_v17  ;;  %319 = vmatmul.msk.f32.gmra.mxu2 %vm54_vm1, %v17_v18 }
   0xf   :  { %322 = vmatmul.msk.f32.gmra.mxu1 %vm54_vm1, %v15_v17  ;;  %324 = vmatmul.msk.f32.gmra.mxu3 %vm54_vm1, %v17_v18 }
  0x14   :  { %51 = vperm.xlu1 %351, %v33_v19   ;;  %41 = vperm.xlu0 %350, %v31_v20  }
  0x16   :  { %326 = vmatmul.msk.f32.vlgmr.msrb.gmra.mxu2 %vm54_vm1, %v14_v5  ;;  %336 = vmatmul.msk.f32.vlgmr.msrb.gmra.mxu0 %vm54_vm1, %v14_v5 }
  0x17   :  { %331 = vmatmul.msk.f32.vlgmr.msrb.gmra.mxu3 %vm54_vm1, %v14_v5  ;;  %341 = vmatmul.msk.f32.vlgmr.msrb.gmra.mxu1 %vm54_vm1, %v14_v5 }
  0x1e   :  { %327 = vmatmul.msk.f32.gmra.mxu2 %vm54_vm1, %v15_v17  ;;  %337 = vmatmul.msk.f32.gmra.mxu0 %vm54_vm1, %v15_v17 }
  0x1f   :  { %332 = vmatmul.msk.f32.gmra.mxu3 %vm54_vm1, %v15_v17  ;;  %342 = vmatmul.msk.f32.gmra.mxu1 %vm54_vm1, %v15_v17 }
  0x26   :  { %328 = vmatmul.msk.f32.gmra.mxu2 %vm54_vm1, %v16_v6  ;;  %338 = vmatmul.msk.f32.gmra.mxu0 %vm54_vm1, %v16_v6 }
  0x27   :  { %333 = vmatmul.msk.f32.gmra.mxu3 %vm54_vm1, %v16_v6  ;;  %343 = vmatmul.msk.f32.gmra.mxu1 %vm54_vm1, %v16_v6 }
  0x2e   :  { %329 = vmatmul.msk.f32.gmra.mxu2 %vm54_vm1, %v17_v18  ;;  %339 = vmatmul.msk.f32.gmra.mxu0 %vm54_vm1, %v17_v18 }
  0x2f   :  { %334 = vmatmul.msk.f32.gmra.mxu3 %vm54_vm1, %v17_v18  ;;  %344 = vmatmul.msk.f32.gmra.mxu1 %vm54_vm1, %v17_v18 }
  0x7e   :  { %v37_v21 = vpop.permute.xlu0 %36  ;;  %v465_v25 = vpop.permute.xlu1 %46 }
  0x83   :  { %v103_v22 = vpop.f32.mrf.mxu0 }
  0x84   :  { %v132_v23 = vpop.f32.mrf.mxu1  ;;  %v104_v24 = vadd.f32 %v103_v22, %v37_v21 }
  0x85   :  { %v133_v26 = vadd.f32 %v132_v23, %v37_v21 }
  0x86   :  { %v260_v27 = vmax.f32 %v104_v24, 0.0  ;;  %v42_v31 = vpop.permute.xlu0 %41  ;;  %v472_v43 = vpop.permute.xlu1 %51 }
  0x87   :  { %v261_v28 = vmax.f32 %v133_v26, 0.0 }
  0x89   :  { %v284_v29 = vpack.c.bf16 %v261_v28, %v260_v27  ;;  %v109_v30 = vpop.f32.mrf.mxu2 }
  0x8a   :  { %v110_v32 = vadd.f32 %v109_v30, %v465_v25  ;;  %v138_v33 = vpop.f32.mrf.mxu3 }
  0x8b   :  { %296 = vst [vmem:[%s532_s3] sm:$0xff] %v284_v29  ;;  %v139_v34 = vadd.f32 %v138_v33, %v465_v25  ;;  %v106_v35 = vpop.f32.mrf.mxu0 }
  0x8c   :  { %v272_v36 = vmax.f32 %v110_v32, 0.0  ;;  %v135_v37 = vpop.f32.mrf.mxu1  ;;  %v107_v38 = vadd.f32 %v106_v35, %v42_v31 }
  0x8d   :  { %v273_v39 = vmax.f32 %v139_v34, 0.0  ;;  %v136_v40 = vadd.f32 %v135_v37, %v42_v31 }
  0x8e   :  { %v266_v41 = vmax.f32 %v107_v38, 0.0 }
  0x8f   :  { %v290_v42 = vpack.c.bf16 %v273_v39, %v272_v36  ;;  %v267_v44 = vmax.f32 %v136_v40, 0.0 }
  0x91   :  { %305 = vst [vmem:[%s532_s3 + $0x30] sm:$0xff] %v290_v42  ;;  %v287_v45 = vpack.c.bf16 %v267_v44, %v266_v41  ;;  %v112_v46 = vpop.f32.mrf.mxu2 }
  0x92   :  { %v113_v47 = vadd.f32 %v112_v46, %v472_v43  ;;  %v141_v48 = vpop.f32.mrf.mxu3 }
  0x93   :  { %302 = vst [vmem:[%s532_s3 + $0x18] sm:$0xff] %v287_v45  ;;  %v142_v49 = vadd.f32 %v141_v48, %v472_v43  ;;  %v219_v50 = vpop.f32.mrf.mxu0 }
  0x94   :  { %v278_v51 = vmax.f32 %v113_v47, 0.0  ;;  %v220_v52 = vadd.f32 %v219_v50, %v37_v21  ;;  %v248_v53 = vpop.f32.mrf.mxu1 }
  0x95   :  { %v279_v54 = vmax.f32 %v142_v49, 0.0  ;;  %v249_v55 = vadd.f32 %v248_v53, %v37_v21 }
  0x96   :  { %v264_v56 = vmax.f32 %v220_v52, 0.0 }
  0x97   :  { %v293_v57 = vpack.c.bf16 %v279_v54, %v278_v51  ;;  %v265_v58 = vmax.f32 %v249_v55, 0.0 }
  0x99   :  { %308 = vst [vmem:[%s532_s3 + $0x48] sm:$0xff] %v293_v57  ;;  %v286_v60 = vpack.c.bf16 %v265_v58, %v264_v56  ;;  %v161_v61 = vpop.f32.mrf.mxu2 }
  0x9a   :  { %v162_v62 = vadd.f32 %v161_v61, %v37_v21  ;;  %v190_v63 = vpop.f32.mrf.mxu3 }
  0x9b   :  { %301 = vst.msk [vmem:[%s532_s3 + $0x10] sm:$0xff] %vm482_vm4, %v286_v60  ;;  %v191_v0 = vadd.f32 %v190_v63, %v37_v21  ;;  %v222_v1 = vpop.f32.mrf.mxu0 }
  0x9c   :  { %v262_v2 = vmax.f32 %v162_v62, 0.0  ;;  %v223_v3 = vadd.f32 %v222_v1, %v42_v31  ;;  %v251_v4 = vpop.f32.mrf.mxu1 }
  0x9d   :  { %v263_v5 = vmax.f32 %v191_v0, 0.0  ;;  %v252_v6 = vadd.f32 %v251_v4, %v42_v31 }
  0x9e   :  { %v270_v7 = vmax.f32 %v223_v3, 0.0 }
  0x9f   :  { %v285_v8 = vpack.c.bf16 %v263_v5, %v262_v2  ;;  %v271_v9 = vmax.f32 %v252_v6, 0.0 }
  0xa1   :  { %297 = vst [vmem:[%s532_s3 + $0x8] sm:$0xff] %v285_v8  ;;  %v289_v10 = vpack.c.bf16 %v271_v9, %v270_v7  ;;  %v164_v11 = vpop.f32.mrf.mxu2 }
  0xa2   :  { %v165_v12 = vadd.f32 %v164_v11, %v42_v31  ;;  %v193_v13 = vpop.f32.mrf.mxu3 }
  0xa3   :  { %304 = vst.msk [vmem:[%s532_s3 + $0x28] sm:$0xff] %vm482_vm4, %v289_v10  ;;  %v194_v14 = vadd.f32 %v193_v13, %v42_v31  ;;  %v225_v15 = vpop.f32.mrf.mxu0 }
  0xa4   :  { %v268_v16 = vmax.f32 %v165_v12, 0.0  ;;  %v226_v17 = vadd.f32 %v225_v15, %v465_v25  ;;  %v254_v18 = vpop.f32.mrf.mxu1 }
  0xa5   :  { %v269_v19 = vmax.f32 %v194_v14, 0.0  ;;  %v255_v20 = vadd.f32 %v254_v18, %v465_v25 }
  0xa6   :  { %v276_v21 = vmax.f32 %v226_v17, 0.0 }
  0xa7   :  { %v288_v22 = vpack.c.bf16 %v269_v19, %v268_v16  ;;  %v277_v23 = vmax.f32 %v255_v20, 0.0 }
  0xa9   :  { %303 = vst [vmem:[%s532_s3 + $0x20] sm:$0xff] %v288_v22  ;;  %v292_v24 = vpack.c.bf16 %v277_v23, %v276_v21  ;;  %v167_v26 = vpop.f32.mrf.mxu2 }
  0xaa   :  { %v168_v27 = vadd.f32 %v167_v26, %v465_v25  ;;  %v196_v28 = vpop.f32.mrf.mxu3 }
  0xab   :  { %307 = vst.msk [vmem:[%s532_s3 + $0x40] sm:$0xff] %vm482_vm4, %v292_v24  ;;  %v197_v29 = vadd.f32 %v196_v28, %v465_v25  ;;  %v228_v30 = vpop.f32.mrf.mxu0 }
  0xac   :  { %v274_v31 = vmax.f32 %v168_v27, 0.0  ;;  %v229_v32 = vadd.f32 %v228_v30, %v472_v43  ;;  %v257_v33 = vpop.f32.mrf.mxu1 }
  0xad   :  { %v275_v34 = vmax.f32 %v197_v29, 0.0  ;;  %v258_v35 = vadd.f32 %v257_v33, %v472_v43 }
  0xae   :  { %v282_v36 = vmax.f32 %v229_v32, 0.0 }
  0xaf   :  { %v291_v37 = vpack.c.bf16 %v275_v34, %v274_v31  ;;  %v283_v38 = vmax.f32 %v258_v35, 0.0 }
  0xb1   :  { %306 = vst [vmem:[%s532_s3 + $0x38] sm:$0xff] %v291_v37  ;;  %v295_v39 = vpack.c.bf16 %v283_v38, %v282_v36  ;;  %v170_v40 = vpop.f32.mrf.mxu2 }
  0xb2   :  { %v171_v41 = vadd.f32 %v170_v40, %v472_v43  ;;  %v199_v25 = vpop.f32.mrf.mxu3 }
  0xb3   :  { %310 = vst.msk [vmem:[%s532_s3 + $0x58] sm:$0xff] %vm482_vm4, %v295_v39  ;;  %v200_v42 = vadd.f32 %v199_v25, %v472_v43 }
  0xb4   :  { %v280_v44 = vmax.f32 %v171_v41, 0.0 }
  0xb5   :  { %v281_v45 = vmax.f32 %v200_v42, 0.0 }
  0xb7   :  { %v294_v46 = vpack.c.bf16 %v281_v45, %v280_v44 }
  0xb9   :  { %309 = vst [vmem:[%s532_s3 + $0x50] sm:$0xff] %v294_v46 }

// kernel: conve_forward.5
= control target key start
LH: loop header
LB: loop body
LE: loop exit
PB: predicated region body
PF: predicated region fallthrough
CT: control target
= control target key end

     0   :  { %s236_s0 = inlined_call_operand.vmem [shape: bf16[8,128], index: 0, kind: input, shape index: {}]   ;;  %s237_s1 = inlined_call_operand.vmem [shape: bf16[128,128], index: 1, kind: input, shape index: {}]   ;;  %s238_s2 = inlined_call_operand.vmem [shape: f32[1,128], index: 2, kind: input, shape index: {}]   ;;  %s239_s3 = inlined_call_operand.hbm [shape: f32[8,128], index: 3, kind: output, shape index: {}]  }
   0x1   :  { %v153_v0 = vld [vmem:[%s237_s1 + $0x38] sm:$0xff]  ;;  %v152_v1 = vld [vmem:[%s237_s1 + $0x30] sm:$0xff] }
   0x2   :  { %84 = vmatpush.bf16.msra.mxu0 %v153_v0 }
   0x3   :  { %8 = vsyncpa [#allocation3], 0  ;;  %v151_v2 = vld [vmem:[%s237_s1 + $0x28] sm:$0xff]  ;;  %v150_v3 = vld [vmem:[%s237_s1 + $0x20] sm:$0xff]  ;;  %s182_s5 = smov [#allocation2]   ;;  %s105_s9 = sshll.u32 %s239_s3, 4  ;;  %s106_s9 = int_to_ptr.hbm [resolvable:$true] %s105_s9 }
   0x4   :  { %v149_v4 = vld [vmem:[%s237_s1 + $0x18] sm:$0xff]  ;;  %v148_v5 = vld [vmem:[%s237_s1 + $0x10] sm:$0xff]  ;;  %v147_v6 = vld [vmem:[%s237_s1 + $0x8] sm:$0xff]  ;;  %s103_s6 = sshll.u32 %s182_s5, 4  ;;  %s104_s6 = int_to_ptr.vmem [resolvable:$true] %s103_s6 }
   0x5   :  { %v146_v7 = vld [vmem:[%s237_s1] sm:$0xff] }
   0x6   :  { %85 = vmatpush.bf16.msra.mxu0 %v152_v1  ;;  %v15_v8 = vld [vmem:[%s236_s0] sm:$0xf] }
   0x7   :  { %v155_v9 = vld [vmem:[%s238_s2] ss:$0 sm:$0xff] }
   0xa   :  { %86 = vmatpush.bf16.msra.mxu0 %v151_v2 }
   0xe   :  { %87 = vmatpush.bf16.msra.mxu0 %v150_v3 }
  0x12   :  { %88 = vmatpush.bf16.msra.mxu0 %v149_v4 }
  0x16   :  { %89 = vmatpush.bf16.msra.mxu0 %v148_v5 }
  0x1a   :  { %90 = vmatpush.bf16.msra.mxu0 %v147_v6 }
  0x1e   :  { %91 = vmatpush.bf16.msra.mxu0 %v146_v7 }
  0x21   :  { %92 = vmatmul.bf16.vlgmr.msra.gmra.mxu0 %v15_v8 }
  0x9e   :  { %v93_v10 = vpop.f32.mrf.mxu0 }
  0x9f   :  { %v94_v11 = vadd.f32 %v155_v9, %v93_v10 }
  0xa1   :  { %97 = vst [vmem:[#allocation2] sm:$0xff] %v94_v11 }
  0xa2   :  { %108 = dma.vmem_to_hbm [thread:$0]  %s104_s6, 128, %s106_s9, [#allocation3]  }
  0xa6   :  { %v95_v12 = vpop.f32.mrf.mxu0 }
  0xa7   :  { %180 = dma.done.wait [#allocation3], 128  }
  0xa8   :  { %181 = vsyncadd [#allocation3], 4294967168 }
  0xa9   :  { %113 = vsyncpa [#allocation3], 1 }

// kernel: conve_forward.4
= control target key start
LH: loop header
LB: loop body
LE: loop exit
PB: predicated region body
PF: predicated region fallthrough
CT: control target
= control target key end

     0   :  { %s1247_s12 = smov 0   ;;  %s1249_s13 = smov 0   ;;  %s1356_s0 = inlined_call_operand.vmem [shape: bf16[8,2688], index: 0, kind: input, shape index: {}]   ;;  %s1357_s1 = inlined_call_operand.vmem [shape: bf16[2688,128], index: 1, kind: input, shape index: {}]   ;;  %s1358_s2 = inlined_call_operand.vmem [shape: f32[1,128], index: 2, kind: input, shape index: {}]   ;;  %s1359_s3 = inlined_call_operand.vmem [shape: bf16[8,128], index: 3, kind: output, shape index: {}]  }
   0x1   :  { %s1251_s14 = smov 0  }
   0x2 LB: > { %s22_s15 = sadd.s32 1, %s1220_s13  ;;  %p888_p0 = scmp.ge.s32.totalorder %s1224_s14, 1  ;;  %s1224_s14 = sphi %s1251_s14, %s13_s14   ;;  %s1220_s13 = sphi %s1249_s13, %s1361_s13   ;;  %s1216_s12 = sphi %s1247_s12, %s1360_s12  }
   0x3   : > { %p23_p1 = scmp.ge.s32.totalorder %s22_s15, 3  ;;  %p167_p2 = scmp.lt.s32.totalorder %s1224_s14, 4 }
   0x5   : > { %s1363_s15 = smov (%p23_p1, %s22_s15), 0  ;;  %p168_p3 = pnand %p888_p0, %p167_p2 }
   0x6   : > { %s199_s16 = smul.u32 (!%p168_p3), 7, %s1216_s12  ;;  %p891_p6 = scmp.ne.s32.totalorder (!%p168_p3), %s1216_s12, 0 }
   0x7   : > { %171 = sbr.rel (%p168_p3) target bundleno = 239 (0xef), region = 32 }
   0x8   : > { %s209_s17 = smul.u32 (!%p168_p3), 112, %s1216_s12  ;;  %p202_p4 = scmp.lt.s32.totalorder (!%p168_p3), %s199_s16, 20 }
   0xa   : > { %p210_p5 = scmp.lt.s32.totalorder (!%p168_p3), %s209_s17, 335 }
   0xc   : > { %s1365_s16 = smov (!%p202_p4, %s199_s16), 20  ;;  %s1367_s17 = smov (!%p210_p5, %s209_s17), 335 }
   0xd   : > { %s889_s18 = sshll.u32 %s1365_s16, 2  ;;  %s890_s22 = sshll.u32 %s1367_s17, 2 }
   0xe   : > { %s1272_s21 = scalar_lea.vmem %s1356_s0, %s889_s18  ;;  %s1277_s25 = scalar_lea.vmem %s1357_s1, %s890_s22 }
   0xf   : > { %222 = sbr.rel (%p891_p6) target bundleno = 22 (0x16), region = 36 }
  0x14   : > { %v1226_v0 = vmov 0.0  }
  0x15   : > { %223 = vst [vmem:[#allocation2] sm:$0xff] %v1226_v0 }
  0x16 PF: > { %v1127_v1 = vld [vmem:[%s1277_s25 + $0x38] sm:$0xff]  ;;  %v1126_v4 = vld [vmem:[%s1277_s25 + $0x30] sm:$0xff]  ;;  %v1125_v8 = vld [vmem:[%s1277_s25 + $0x28] sm:$0xff]  ;;  %p1116_p7 = scmp.ne.s32.totalorder %s1216_s12, 2 }
  0x17   : > { %v1135_v2 = vld [vmem:[%s1277_s25 + $0x78] sm:$0xff]  ;;  %702 = vmatpush.bf16.msra.mxu0 %v1127_v1  ;;  %v1134_v5 = vld [vmem:[%s1277_s25 + $0x70] sm:$0xff]  ;;  %v1133_v9 = vld [vmem:[%s1277_s25 + $0x68] sm:$0xff] }
  0x18   : > { %v1143_v3 = vld [vmem:[%s1277_s25 + $0xb8] sm:$0xff]  ;;  %715 = vmatpush.bf16.msra.mxu1 %v1135_v2  ;;  %v1142_v6 = vld [vmem:[%s1277_s25 + $0xb0] sm:$0xff]  ;;  %v1141_v10 = vld [vmem:[%s1277_s25 + $0xa8] sm:$0xff] }
  0x19   : > { %728 = vmatpush.bf16.msra.mxu2 %v1143_v3  ;;  %v1151_v7 = vld [vmem:[%s1277_s25 + $0xf8] sm:$0xff]  ;;  %v1150_v11 = vld [vmem:[%s1277_s25 + $0xf0] sm:$0xff]  ;;  %v1124_v12 = vld [vmem:[%s1277_s25 + $0x20] sm:$0xff] }
  0x1a   : > { %741 = vmatpush.bf16.msra.mxu3 %v1151_v7  ;;  %v1132_v13 = vld [vmem:[%s1277_s25 + $0x60] sm:$0xff]  ;;  %v1149_v15 = vld [vmem:[%s1277_s25 + $0xe8] sm:$0xff]  ;;  %v1123_v16 = vld [vmem:[%s1277_s25 + $0x18] sm:$0xff] }
  0x1b   : > { %703 = vmatpush.bf16.msra.mxu0 %v1126_v4  ;;  %v1140_v14 = vld [vmem:[%s1277_s25 + $0xa0] sm:$0xff]  ;;  %v1131_v17 = vld [vmem:[%s1277_s25 + $0x58] sm:$0xff]  ;;  %v1122_v20 = vld [vmem:[%s1277_s25 + $0x10] sm:$0xff] }
  0x1c   : > { %716 = vmatpush.bf16.msra.mxu1 %v1134_v5  ;;  %v1139_v18 = vld [vmem:[%s1277_s25 + $0x98] sm:$0xff]  ;;  %v1148_v19 = vld [vmem:[%s1277_s25 + $0xe0] sm:$0xff]  ;;  %v1130_v21 = vld [vmem:[%s1277_s25 + $0x50] sm:$0xff] }
  0x1d   : > { %729 = vmatpush.bf16.msra.mxu2 %v1142_v6  ;;  %v1138_v22 = vld [vmem:[%s1277_s25 + $0x90] sm:$0xff]  ;;  %v1147_v23 = vld [vmem:[%s1277_s25 + $0xd8] sm:$0xff]  ;;  %v1121_v24 = vld [vmem:[%s1277_s25 + $0x8] sm:$0xff] }
  0x1e   : > { %742 = vmatpush.bf16.msra.mxu3 %v1150_v11  ;;  %v1129_v25 = vld [vmem:[%s1277_s25 + $0x48] sm:$0xff]  ;;  %v225_v26 = vld [vmem:[%s1272_s21] sm:$0xff]  ;;  %v1146_v28 = vld [vmem:[%s1277_s25 + $0xd0] sm:$0xff] }
  0x1f   : > { %704 = vmatpush.bf16.msra.mxu0 %v1125_v8  ;;  %v1137_v27 = vld [vmem:[%s1277_s25 + $0x88] sm:$0xff]  ;;  %v345_v30 = vunpack.c.l.b16 %v225_v26  ;;  %v1120_v31 = vld [vmem:[%s1277_s25] sm:$0xff]  ;;  %v346_v34 = vunpack.c.h.b16 %v225_v26  ;;  %v1159_v36 = vld [vmem:[%s1277_s25 + $0x138] sm:$0xff] }
  0x20   : > { %717 = vmatpush.bf16.msra.mxu1 %v1133_v9  ;;  %v226_v29 = vld [vmem:[%s1272_s21 + $0x8] sm:$0xff]  ;;  %v1128_v32 = vld [vmem:[%s1277_s25 + $0x40] sm:$0xff]  ;;  %v1167_v37 = vld [vmem:[%s1277_s25 + $0x178] sm:$0xff] }
  0x21   : > { %730 = vmatpush.bf16.msra.mxu2 %v1141_v10  ;;  %v347_v33 = vunpack.c.l.b16 %v226_v29  ;;  %v1136_v35 = vld [vmem:[%s1277_s25 + $0x80] sm:$0xff]  ;;  %v1175_v38 = vld [vmem:[%s1277_s25 + $0x1b8] sm:$0xff]  ;;  %v1145_v39 = vld [vmem:[%s1277_s25 + $0xc8] sm:$0xff]  ;;  %v352_v40 = vpack.c.b16 %v345_v30, %v345_v30  ;;  %v353_v42 = vpack.c.b16 %v346_v34, %v346_v34  ;;  %v348_v47 = vunpack.c.h.b16 %v226_v29 }
  0x22   : > { %743 = vmatpush.bf16.msra.mxu3 %v1149_v15  ;;  %v1158_v43 = vld [vmem:[%s1277_s25 + $0x130] sm:$0xff]  ;;  %v1144_v46 = vld [vmem:[%s1277_s25 + $0xc0] sm:$0xff]  ;;  %v1157_v48 = vld [vmem:[%s1277_s25 + $0x128] sm:$0xff] }
  0x23   : > { %705 = vmatpush.bf16.msra.mxu0 %v1124_v12  ;;  %v354_v41 = vpack.c.b16 %v347_v33, %v347_v33  ;;  %v1166_v44 = vld [vmem:[%s1277_s25 + $0x170] sm:$0xff]  ;;  %v1165_v49 = vld [vmem:[%s1277_s25 + $0x168] sm:$0xff]  ;;  %v355_v51 = vpack.c.b16 %v348_v47, %v348_v47  ;;  %v1156_v52 = vld [vmem:[%s1277_s25 + $0x120] sm:$0xff] }
  0x24   : > { %718 = vmatpush.bf16.msra.mxu1 %v1132_v13  ;;  %v1174_v45 = vld [vmem:[%s1277_s25 + $0x1b0] sm:$0xff]  ;;  %v1173_v50 = vld [vmem:[%s1277_s25 + $0x1a8] sm:$0xff]  ;;  %v1164_v53 = vld [vmem:[%s1277_s25 + $0x160] sm:$0xff] }
  0x25   : > { %731 = vmatpush.bf16.msra.mxu2 %v1140_v14  ;;  %v1172_v54 = vld [vmem:[%s1277_s25 + $0x1a0] sm:$0xff]  ;;  %v1155_v55 = vld [vmem:[%s1277_s25 + $0x118] sm:$0xff]  ;;  %v1154_v58 = vld [vmem:[%s1277_s25 + $0x110] sm:$0xff] }
  0x26   : > { %744 = vmatpush.bf16.msra.mxu3 %v1148_v19  ;;  %v1163_v56 = vld [vmem:[%s1277_s25 + $0x158] sm:$0xff]  ;;  %v1162_v59 = vld [vmem:[%s1277_s25 + $0x150] sm:$0xff]  ;;  %v1153_v61 = vld [vmem:[%s1277_s25 + $0x108] sm:$0xff] }
  0x27   : > { %706 = vmatpush.bf16.msra.mxu0 %v1123_v16  ;;  %v1171_v57 = vld [vmem:[%s1277_s25 + $0x198] sm:$0xff]  ;;  %v1170_v60 = vld [vmem:[%s1277_s25 + $0x190] sm:$0xff]  ;;  %v1161_v63 = vld [vmem:[%s1277_s25 + $0x148] sm:$0xff] }
  0x28   : > { %719 = vmatpush.bf16.msra.mxu1 %v1131_v17  ;;  %v227_v62 = vld [vmem:[%s1272_s21 + $0x10] sm:$0xff]  ;;  %v1169_v0 = vld [vmem:[%s1277_s25 + $0x188] sm:$0xff]  ;;  %v228_v1 = vld [vmem:[%s1272_s21 + $0x18] sm:$0xf] }
  0x29   : > { %732 = vmatpush.bf16.msra.mxu2 %v1139_v18  ;;  %v349_v2 = vunpack.c.l.b16 %v227_v62  ;;  %v1152_v3 = vld [vmem:[%s1277_s25 + $0x100] sm:$0xff]  ;;  %v350_v4 = vunpack.c.h.b16 %v227_v62  ;;  %v351_v5 = vunpack.c.l.b16 %v228_v1 }
  0x2a   : > { %745 = vmatpush.bf16.msra.mxu3 %v1147_v23  ;;  %v1160_v6 = vld [vmem:[%s1277_s25 + $0x140] sm:$0xff] }
  0x2b   : > { %707 = vmatpush.bf16.msra.mxu0 %v1122_v20  ;;  %v1168_v7 = vld [vmem:[%s1277_s25 + $0x180] sm:$0xff]  ;;  %v356_v8 = vpack.c.b16 %v349_v2, %v349_v2  ;;  %v357_v9 = vpack.c.b16 %v350_v4, %v350_v4  ;;  %v358_v10 = vpack.c.b16 %v351_v5, %v351_v5 }
  0x2c   : > { %720 = vmatpush.bf16.msra.mxu1 %v1130_v21  ;;  %v224_v26 = vld [vmem:[#allocation2] sm:$0xff] }
  0x2d   : > { %733 = vmatpush.bf16.msra.mxu2 %v1138_v22 }
  0x2e   : > { %746 = vmatpush.bf16.msra.mxu3 %v1146_v28 }
  0x2f   : > { %708 = vmatpush.bf16.msra.mxu0 %v1121_v24 }
  0x30   : > { %721 = vmatpush.bf16.msra.mxu1 %v1129_v25 }
  0x31   : > { %734 = vmatpush.bf16.msra.mxu2 %v1137_v27 }
  0x32   : > { %747 = vmatpush.bf16.msra.mxu3 %v1145_v39 }
  0x33   : > { %709 = vmatpush.bf16.msra.mxu0 %v1120_v31 }
  0x34   : > { %722 = vmatpush.bf16.msra.mxu1 %v1128_v32 }
  0x35   : > { %735 = vmatpush.bf16.msra.mxu2 %v1136_v35 }
  0x36   : > { %710 = vmatmul.bf16.vlgmr.msra.gmra.mxu0 %v352_v40  ;;  %748 = vmatpush.bf16.msra.mxu3 %v1144_v46 }
  0x37   : > { %754 = vmatpush.bf16.msrb.mxu0 %v1159_v36  ;;  %723 = vmatmul.bf16.vlgmr.msra.gmra.mxu1 %v353_v42 }
  0x38   : > { %767 = vmatpush.bf16.msrb.mxu1 %v1167_v37  ;;  %736 = vmatmul.bf16.vlgmr.msra.gmra.mxu2 %v354_v41 }
  0x39   : > { %780 = vmatpush.bf16.msrb.mxu2 %v1175_v38  ;;  %749 = vmatmul.bf16.vlgmr.msra.gmra.mxu3 %v355_v51 }
  0x3b   : > { %755 = vmatpush.bf16.msrb.mxu0 %v1158_v43 }
  0x3c   : > { %768 = vmatpush.bf16.msrb.mxu1 %v1166_v44 }
  0x3d   : > { %781 = vmatpush.bf16.msrb.mxu2 %v1174_v45 }
  0x3f   : > { %756 = vmatpush.bf16.msrb.mxu0 %v1157_v48 }
  0x40   : > { %769 = vmatpush.bf16.msrb.mxu1 %v1165_v49 }
  0x41   : > { %782 = vmatpush.bf16.msrb.mxu2 %v1173_v50 }
  0x43   : > { %757 = vmatpush.bf16.msrb.mxu0 %v1156_v52 }
  0x44   : > { %770 = vmatpush.bf16.msrb.mxu1 %v1164_v53 }
  0x45   : > { %783 = vmatpush.bf16.msrb.mxu2 %v1172_v54 }
  0x47   : > { %758 = vmatpush.bf16.msrb.mxu0 %v1155_v55 }
  0x48   : > { %771 = vmatpush.bf16.msrb.mxu1 %v1163_v56 }
  0x49   : > { %784 = vmatpush.bf16.msrb.mxu2 %v1171_v57 }
  0x4b   : > { %759 = vmatpush.bf16.msrb.mxu0 %v1154_v58 }
  0x4c   : > { %772 = vmatpush.bf16.msrb.mxu1 %v1162_v59 }
  0x4d   : > { %785 = vmatpush.bf16.msrb.mxu2 %v1170_v60 }
  0x4f   : > { %760 = vmatpush.bf16.msrb.mxu0 %v1153_v61 }
  0x50   : > { %773 = vmatpush.bf16.msrb.mxu1 %v1161_v63 }
  0x51   : > { %786 = vmatpush.bf16.msrb.mxu2 %v1169_v0 }
  0x53   : > { %761 = vmatpush.bf16.msrb.mxu0 %v1152_v3 }
  0x54   : > { %774 = vmatpush.bf16.msrb.mxu1 %v1160_v6 }
  0x55   : > { %787 = vmatpush.bf16.msrb.mxu2 %v1168_v7 }
  0x56   : > { %762 = vmatmul.bf16.vlgmr.msrb.gmra.mxu0 %v356_v8 }
  0x57   : > { %775 = vmatmul.bf16.vlgmr.msrb.gmra.mxu1 %v357_v9 }
  0x58   : > { %788 = vmatmul.bf16.vlgmr.msrb.gmra.mxu2 %v358_v10 }
  0xb3   : > { %v711_v11 = vpop.f32.mrf.mxu0 }
  0xb4   : > { %v724_v12 = vpop.f32.mrf.mxu1 }
  0xb5   : > { %v725_v18 = vadd.f32 %v724_v12, %v711_v11 }
  0xbb   : > { %v737_v13 = vpop.f32.mrf.mxu2  ;;  %v713_v14 = vpop.f32.mrf.mxu0 }
  0xbc   : > { %v726_v15 = vpop.f32.mrf.mxu1  ;;  %v750_v16 = vpop.f32.mrf.mxu3  ;;  %v738_v20 = vadd.f32 %v737_v13, %v725_v18 }
  0xbe   : > { %v751_v21 = vadd.f32 %v750_v16, %v738_v20 }
  0xc3   : > { %v739_v17 = vpop.f32.mrf.mxu2 }
  0xc4   : > { %v752_v19 = vpop.f32.mrf.mxu3 }
  0xd3   : > { %v763_v22 = vpop.f32.mrf.mxu0 }
  0xd4   : > { %v776_v23 = vpop.f32.mrf.mxu1  ;;  %v764_v24 = vadd.f32 %v763_v22, %v751_v21 }
  0xd6   : > { %v777_v25 = vadd.f32 %v776_v23, %v764_v24 }
  0xdb   : > { %v789_v27 = vpop.f32.mrf.mxu2  ;;  %v765_v29 = vpop.f32.mrf.mxu0 }
  0xdc   : > { %v790_v28 = vadd.f32 %v789_v27, %v777_v25  ;;  %v778_v30 = vpop.f32.mrf.mxu1 }
  0xde   : > { %v793_v31 = vadd.f32 %v790_v28, %v224_v26 }
  0xdf   : > { %798 = sbr.rel (%p1116_p7) target bundleno = 239 (0xef), region = 40 }
  0xe0   : > { %794 = vst [vmem:[#allocation2] sm:$0xff] %v793_v31 }
  0xe3   : > { %v791_v32 = vpop.f32.mrf.mxu2 }
  0xe4   : > { %v1201_v34 = vld [vmem:[%s1358_s2] ss:$0 sm:$0xff] }
  0xe7   : > { %v799_v33 = vld [vmem:[#allocation2] sm:$0xff] }
  0xe8   : > { %v804_v35 = vadd.f32 %v1201_v34, %v799_v33 }
  0xea   : > { %v805_v36 = vmax.f32 %v804_v35, 0.0 }
  0xec   : > { %v806_v37 = vpack.c.bf16 %v805_v36, %v805_v36 }
  0xee   : > { %807 = vst [vmem:[%s1359_s3] sm:$0xf] %v806_v37 }
  0xef PF: > { %s13_s14 = sadd.s32 1, %s1224_s14   ;;  %s1360_s12 = smov %s1220_s13 }
  0xf0   : > { %p10_p8 = scmp.ge.s32.totalorder %s13_s14, 5   ;;  %s1361_s13 = smov %s1363_s15 }
  0xf2   :  { %12 = sbr.rel (!%p10_p8) target bundleno = 2 (0x2), region = 73 }

</bundles_post_ra>
